<compile_context>
chip_gen: v5e
topology: v5e:2x2
jax: 0.10.0
libtpu: 0.0.40
codegen_flags: <defaults>
</compile_context>

<pallas_src>
import functools

import jax
import jax.numpy as jnp
from jax.experimental import pallas as pl
from jax.experimental.pallas import tpu as pltpu


def make_positional_table(num_hiddens: int, max_len: int = 1000) -> jnp.ndarray:
    """Replicates PositionalEncoding.__init__ : P of shape (1, max_len, num_hiddens)."""
    pos = jnp.arange(max_len, dtype=jnp.float32).reshape(-1, 1)          # (max_len, 1)
    div = jnp.power(
        10000.0,
        jnp.arange(0, num_hiddens, 2, dtype=jnp.float32) / num_hiddens)  # (ceil(D/2),)
    X = pos / div                                                        # (max_len, ceil(D/2))
    P = jnp.zeros((max_len, num_hiddens), dtype=jnp.float32)
    P = P.at[:, 0::2].set(jnp.sin(X))
    P = P.at[:, 1::2].set(jnp.cos(X)[:, : num_hiddens // 2])             # cos columns
    return P[None, :, :]                                                 # (1, max_len, D)


# ----------------------------------------------------------------------------
# Kernels: pure elementwise on 2-D (rows, lanes) tiles.
# ----------------------------------------------------------------------------
def _pe_kernel(x_ref, p_ref, o_ref, *, scale: float):
    # x_ref: (tR, L), p_ref: (1, L) broadcast over rows, o_ref: (tR, L)
    o_ref[...] = (x_ref[...] * scale + p_ref[...]).astype(o_ref.dtype)


def _pe_dropout_kernel(x_ref, p_ref, m_ref, o_ref, *, scale: float, inv_keep: float):
    # m_ref holds the 0/1 keep mask in x's dtype; inverted dropout scales kept
    # values by 1/(1-p).
    y = x_ref[...] * scale + p_ref[...]
    o_ref[...] = (y * (m_ref[...] * inv_keep)).astype(o_ref.dtype)


# ----------------------------------------------------------------------------
# Wrapper
# ----------------------------------------------------------------------------
def _choose_row_tile(rows: int, lanes: int, itemsize: int) -> int:
    # ~2 MiB per input block; with x + mask + out double-buffered plus the
    # resident P row this stays far below the 48 MiB working-set cap, which is
    # safe on v7x's 64 MiB VMEM and under v5e's raised scoped limit.
    budget_rows = max(8, (2 * 1024 * 1024) // max(1, lanes * itemsize))
    if rows <= budget_rows:
        return rows                       # single block over rows (full-dim block is legal)
    return (budget_rows // 8) * 8         # keep sublane dim a multiple of 8


def positional_encoding_forward(x: jnp.ndarray,
                                P: jnp.ndarray,
                                dropout_p: float = 0.0,
                                scale: float = 1.0,
                                training: bool = True,
                                rng_key=None) -> jnp.ndarray:
    """x: (B, S, D). P: (1, max_len, D). Returns dropout(x*scale + P[:, :S, :])."""
    B, S, D = x.shape
    L = S * D
    eff_p = float(dropout_p) if training else 0.0

    x2 = x.reshape(B, L)                                   # lane-dense (rows, lanes)
    p2 = P[0, :S, :].reshape(1, L).astype(x.dtype)         # one row, broadcast over batch

    tR = _choose_row_tile(B, L, jnp.dtype(x.dtype).itemsize)
    grid = (pl.cdiv(B, tR),)

    row_spec = pl.BlockSpec((tR, L), lambda r: (r, 0))
    p_spec = pl.BlockSpec((1, L), lambda r: (0, 0))

    cparams = pltpu.CompilerParams(
        dimension_semantics=("parallel",),                 # rows are independent
        vmem_limit_bytes=48 * 1024 * 1024)

    if eff_p > 0.0:
        if rng_key is None:
            rng_key = jax.random.PRNGKey(0)
        keep = jax.random.bernoulli(rng_key, 1.0 - eff_p, (B, S, D)).astype(x.dtype)
        keep2 = keep.reshape(B, L)
        kernel = functools.partial(_pe_dropout_kernel,
                                   scale=float(scale),
                                   inv_keep=float(1.0 / (1.0 - eff_p)))
        out2 = pl.pallas_call(
            kernel,
            out_shape=jax.ShapeDtypeStruct((B, L), x.dtype),
            grid_spec=pltpu.PrefetchScalarGridSpec(
                num_scalar_prefetch=0,
                grid=grid,
                in_specs=[row_spec, p_spec, row_spec],
                out_specs=row_spec),
            compiler_params=cparams,
        )(x2, p2, keep2)
    else:
        kernel = functools.partial(_pe_kernel, scale=float(scale))
        out2 = pl.pallas_call(
            kernel,
            out_shape=jax.ShapeDtypeStruct((B, L), x.dtype),
            grid_spec=pltpu.PrefetchScalarGridSpec(
                num_scalar_prefetch=0,
                grid=grid,
                in_specs=[row_spec, p_spec],
                out_specs=row_spec),
            compiler_params=cparams,
        )(x2, p2)

    return out2.reshape(B, S, D)


if __name__ == "__main__":
    # Small shapes implied by the module: (batch, seq, num_hiddens)
    B, S, D = 2, 8, 32
    vocab = 50
    dropout = 0.1
    max_len = 1000

    key = jax.random.PRNGKey(0)
    k_emb, k_tok = jax.random.split(key, 2)

    # Embedding lookup + sqrt(num_hiddens) scale as in TransformerDecoder.forward
    emb_table = jax.random.normal(k_emb, (vocab, D), dtype=jnp.float32)
    tokens = jax.random.randint(k_tok, (B, S), 0, vocab)
    x = emb_table[tokens]                                  # (B, S, D)
    scale = float(D) ** 0.5

    P = make_positional_table(D, max_len)

    # 1) Eval mode (dropout off): must equal x*sqrt(D) + P[:, :S, :]
    out_eval = positional_encoding_forward(x, P, dropout_p=dropout, scale=scale,
                                           training=False)
    out_eval = jax.block_until_ready(out_eval)
    ref = x * scale + P[:, :S, :]
    assert out_eval.shape == (B, S, D)
    assert jnp.allclose(out_eval, ref, atol=1e-5, rtol=1e-5), "eval-mode mismatch"

    # 2) Training mode: mask is reproducible from the key, so check exactly.
    drop_key = jax.random.PRNGKey(123)
    out_train = positional_encoding_forward(x, P, dropout_p=dropout, scale=scale,
                                            training=True, rng_key=drop_key)
    out_train = jax.block_until_ready(out_train)
    keep = jax.random.bernoulli(drop_key, 1.0 - dropout, (B, S, D))
    ref_train = jnp.where(keep, ref / (1.0 - dropout), 0.0)
    assert out_train.shape == (B, S, D)
    assert jnp.allclose(out_train, ref_train, atol=1e-4, rtol=1e-4), \
        "train-mode dropout mismatch"

    print("KERNEL_OK")
</pallas_src>

<mosaic_0001>
module attributes {stable_mosaic.version = 11 : i64} {
  func.func @_pe_kernel(%arg0: i32, %arg1: memref<2x256xf32, #tpu.memory_space<vmem>>, %arg2: memref<1x256xf32, #tpu.memory_space<vmem>>, %arg3: memref<2x256xf32, #tpu.memory_space<vmem>>) attributes {dimension_semantics = [#tpu.dimension_semantics<parallel>], iteration_bounds = array<i64: 1>, scalar_prefetch = 0 : i64, scratch_operands = 0 : i64, tpu.core_type = #tpu.core_type<tc>, window_params = [{transform_indices = @transform_0, window_bounds = array<i64: 2, 256>}, {pipeline_mode = #tpu.pipeline_mode<synchronous>, transform_indices = @transform_1, window_bounds = array<i64: 1, 256>}, {transform_indices = @transform_2, window_bounds = array<i64: 2, 256>}]} {
    %c0 = arith.constant 0 : index
    %c0_0 = arith.constant 0 : index
    %0 = vector.load %arg1[%c0, %c0_0] : memref<2x256xf32, #tpu.memory_space<vmem>>, vector<2x256xf32>
    %cst = arith.constant 5.65685415 : f32
    %1 = vector.broadcast %cst : f32 to vector<2x256xf32>
    %2 = arith.mulf %0, %1 : vector<2x256xf32>
    %c0_1 = arith.constant 0 : index
    %c0_2 = arith.constant 0 : index
    %3 = vector.load %arg2[%c0_1, %c0_2] : memref<1x256xf32, #tpu.memory_space<vmem>>, vector<1x256xf32>
    %4 = vector.broadcast %3 : vector<1x256xf32> to vector<2x256xf32>
    %5 = arith.addf %2, %4 : vector<2x256xf32>
    %c0_3 = arith.constant 0 : index
    %c0_4 = arith.constant 0 : index
    %6 = vector.load %arg3[%c0_3, %c0_4] : memref<2x256xf32, #tpu.memory_space<vmem>>, vector<2x256xf32>
    tpu.vector_store %arg3[%c0_3, %c0_4], %5 {strides = array<i32>} : memref<2x256xf32, #tpu.memory_space<vmem>>, vector<2x256xf32>,
    return
  }
  func.func @transform_0(%arg0: i32) -> (i32, i32) {
    %c0_i32 = arith.constant 0 : i32
    %c0_i32_0 = arith.constant 0 : i32
    return %arg0, %c0_i32 : i32, i32
  }
  func.func @transform_1(%arg0: i32) -> (i32, i32) {
    %c0_i32 = arith.constant 0 : i32
    %c0_i32_0 = arith.constant 0 : i32
    %c0_i32_1 = arith.constant 0 : i32
    return %c0_i32, %c0_i32_0 : i32, i32
  }
  func.func @transform_2(%arg0: i32) -> (i32, i32) {
    %c0_i32 = arith.constant 0 : i32
    %c0_i32_0 = arith.constant 0 : i32
    return %arg0, %c0_i32 : i32, i32
  }
}

</mosaic_0001>

<bundles_post_ra>
// kernel: tpu_custom_call.1
= control target key start
LH: loop header
LB: loop body
LE: loop exit
PB: predicated region body
PF: predicated region fallthrough
CT: control target
= control target key end

     0   :  { %7 = vsyncpa [#allocation3], 0  ;;  %s178_s0 = inlined_call_operand.hbm [shape: f32[2,256], index: 0, kind: input, shape index: {}]   ;;  %s179_s1 = inlined_call_operand.hbm [shape: f32[1,256], index: 1, kind: input, shape index: {}]   ;;  %s180_s2 = inlined_call_operand.hbm [shape: f32[2,256], index: 2, kind: output, shape index: {}]  }
   0x1   :  { %8 = vsyncpa [#allocation6], 0 }
   0x2   :  { %9 = vsyncpa [#allocation4], 0  ;;  %s15_s11 = sshll.u32 %s178_s0, 4  ;;  %s151_s12 = smov [#allocation2]   ;;  %s16_s11 = int_to_ptr.hbm [resolvable:$true] %s15_s11 }
   0x3   :  { %s17_s13 = sshll.u32 %s151_s12, 4  ;;  %s26_s16 = sshll.u32 %s179_s1, 4  ;;  %s18_s13 = int_to_ptr.vmem [resolvable:$true] %s17_s13  ;;  %s27_s16 = int_to_ptr.hbm [resolvable:$true] %s26_s16 }
   0x4   :  { %20 = dma.hbm_to_vmem [thread:$0]  %s16_s11, 64, %s18_s13, [#allocation3]  }
   0x5   :  { %s152_s17 = smov [#allocation5]  }
   0x6   :  { %s28_s18 = sshll.u32 %s152_s17, 4  ;;  %s29_s18 = int_to_ptr.vmem [resolvable:$true] %s28_s18 }
   0x7   :  { %31 = dma.hbm_to_vmem [thread:$0]  %s27_s16, 32, %s29_s18, [#allocation6]  }
   0x8   :  { %145 = dma.done.wait [#allocation3], 64  }
   0x9   :  { %146 = vsyncadd [#allocation3], 4294967232 }
   0xa   :  { %147 = dma.done.wait [#allocation6], 32  }
   0xb   :  { %148 = vsyncadd [#allocation6], 4294967264  ;;  %v40_v0 = vld [vmem:[#allocation2] sm:$0xf]  ;;  %v42_v1 = vld [vmem:[#allocation5] sm:$0x3] }
   0xc   :  { %v44_v2 = vperm.slane %v42_v1, 0  ;;  %v45_v3 = vperm.slane %v42_v1, 1  ;;  %v41_v4 = vmul.f32 5.656854, %v40_v0  ;;  %vm47_vm0 = vcmask 1041408   ;;  %s153_s0 = smov [#allocation7]  }
   0xd   :  { %s57_s19 = sshll.u32 %s153_s0, 4  ;;  %s59_s21 = sshll.u32 %s180_s2, 4  ;;  %s58_s19 = int_to_ptr.vmem [resolvable:$true] %s57_s19  ;;  %s60_s21 = int_to_ptr.hbm [resolvable:$true] %s59_s21 }
   0xe   :  { %v46_v5 = vrot.slane %v45_v3, 6 }
  0x10   :  { %v48_v6 = vsel %vm47_vm0, %v44_v2, %v46_v5 }
  0x11   :  { %v50_v7 = vadd.f32 %v48_v6, %v41_v4 }
  0x13   :  { %51 = vst [vmem:[#allocation7] sm:$0xf] %v50_v7 }
  0x14   :  { %62 = dma.vmem_to_hbm [thread:$0]  %s58_s19, 64, %s60_s21, [#allocation4]  }
  0x15   :  { %149 = dma.done.wait [#allocation4], 64  }
  0x16   :  { %150 = vsyncadd [#allocation4], 4294967232 }
  0x17   :  { %67 = vsyncpa [#allocation3], 1 }
  0x18   :  { %68 = vsyncpa [#allocation6], 1 }
  0x19   :  { %69 = vsyncpa [#allocation4], 1 }

</bundles_post_ra>
